<compile_context>
chip_gen: v7x
topology: tpu7x:2x2x1
jax: 0.10.0
libtpu: 0.0.40
codegen_flags: <defaults>
</compile_context>

<pallas_src>
import math

import jax
import jax.numpy as jnp
from jax.experimental import pallas as pl
from jax.experimental.pallas import tpu as pltpu


_LANE_COLS = 1024        # lane-dense last dim: large multiple of 128 (unmasked vst)
_MAX_BLOCK_ROWS = 512    # 512 x 1024 x 4B = 2 MiB/tile -> 3 arrays x 2 bufs = 12 MiB VMEM


def _round_up(n: int, m: int) -> int:
    return ((n + m - 1) // m) * m


def _lerp_kernel(alpha_ref, x_ref, y_ref, o_ref):
    # alpha lives in SMEM as a length-1 float32 (32-bit scalar path) regardless
    # of tensor dtype; o = x + a*(y - x) keeps the VPU work to a mul + add pair
    # with f32 accumulation, cast back to the output dtype on store.
    a = alpha_ref[0]
    x = x_ref[...]
    y = y_ref[...]
    o_ref[...] = (x + a * (y - x)).astype(o_ref.dtype)


def weighted_sum(x, y, alpha, *, min_pallas_elems: int = 1 << 20):
    """out = (1 - alpha) * x + alpha * y, elementwise, any shape."""
    assert x.shape == y.shape and x.dtype == y.dtype
    orig_shape = x.shape
    total = math.prod(orig_shape) if orig_shape else 1
    a32 = jnp.asarray(alpha, dtype=jnp.float32)

    # Small / degenerate inputs: one grid step + launch overhead dwarfs the
    # HBM traffic -- let XLA fuse a plain lerp instead.
    if total == 0 or total < min_pallas_elems:
        return (x + a32 * (y - x)).astype(x.dtype)

    # Flatten to a lane-dense (rows, _LANE_COLS) slab; pad the tail so the
    # block shape divides the array exactly (keeps (8,128) tiling clean and
    # avoids out-of-bounds block handling).
    cols = _LANE_COLS
    rows = -(-total // cols)                                  # cdiv
    block_rows = min(_MAX_BLOCK_ROWS, _round_up(rows, 8))     # multiple of 8
    rows_padded = _round_up(rows, block_rows)
    padded_total = rows_padded * cols

    xf = x.ravel()
    yf = y.ravel()
    if padded_total != total:
        pad = padded_total - total
        xf = jnp.pad(xf, (0, pad))
        yf = jnp.pad(yf, (0, pad))
    x2 = xf.reshape(rows_padded, cols)
    y2 = yf.reshape(rows_padded, cols)
    alpha_arr = a32.reshape(1)

    itemsize = jnp.dtype(x.dtype).itemsize
    cost = pl.CostEstimate(
        flops=3 * total,
        transcendentals=0,
        bytes_accessed=3 * padded_total * itemsize,
    )

    out2 = pl.pallas_call(
        _lerp_kernel,
        out_shape=jax.ShapeDtypeStruct((rows_padded, cols), x.dtype),
        grid=(rows_padded // block_rows,),
        in_specs=[
            pl.BlockSpec(memory_space=pltpu.SMEM),                # alpha, untiled
            pl.BlockSpec((block_rows, cols), lambda i: (i, 0)),   # x tile
            pl.BlockSpec((block_rows, cols), lambda i: (i, 0)),   # y tile
        ],
        out_specs=pl.BlockSpec((block_rows, cols), lambda i: (i, 0)),
        compiler_params=pltpu.CompilerParams(
            dimension_semantics=("parallel",),
        ),
        cost_estimate=cost,
    )(alpha_arr, x2, y2)

    return out2.ravel()[:total].reshape(orig_shape)


if __name__ == "__main__":
    alpha = 0.3

    # Test 1: small NCHW input (2, 4, 16, 16); force the Pallas path so the
    # kernel itself is exercised even below the size threshold.
    kx, ky = jax.random.split(jax.random.PRNGKey(0))
    x = jax.random.normal(kx, (2, 4, 16, 16), dtype=jnp.float32)
    y = jax.random.normal(ky, (2, 4, 16, 16), dtype=jnp.float32)
    out = weighted_sum(x, y, alpha, min_pallas_elems=0)
    jax.block_until_ready(out)
    ref = x + jnp.float32(alpha) * (y - x)
    assert out.shape == x.shape and out.dtype == x.dtype
    assert jnp.allclose(out, ref, atol=1e-6, rtol=1e-6), "small-case mismatch"

    # Test 2: larger NCHW input with a ragged tail -> multi-block grid + padding.
    kx2, ky2 = jax.random.split(jax.random.PRNGKey(1))
    x2 = jax.random.normal(kx2, (2, 128, 60, 60), dtype=jnp.float32)
    y2 = jax.random.normal(ky2, (2, 128, 60, 60), dtype=jnp.float32)
    out2 = weighted_sum(x2, y2, alpha, min_pallas_elems=0)
    jax.block_until_ready(out2)
    ref2 = x2 + jnp.float32(alpha) * (y2 - x2)
    assert out2.shape == x2.shape and out2.dtype == x2.dtype
    assert jnp.allclose(out2, ref2, atol=1e-6, rtol=1e-6), "tiled-case mismatch"

    print("KERNEL_OK")
</pallas_src>

<mosaic_0001>
module attributes {stable_mosaic.version = 11 : i64} {
  func.func @_lerp_kernel(%arg0: i32, %arg1: memref<1xf32, #tpu.memory_space<smem>>, %arg2: memref<8x1024xf32, #tpu.memory_space<vmem>>, %arg3: memref<8x1024xf32, #tpu.memory_space<vmem>>, %arg4: memref<8x1024xf32, #tpu.memory_space<vmem>>) attributes {dimension_semantics = [#tpu.dimension_semantics<parallel>], iteration_bounds = array<i64: 1>, scalar_prefetch = 0 : i64, scratch_operands = 0 : i64, tpu.core_type = #tpu.core_type<tc>, window_params = [{transform_indices = @transform_0, window_bounds = array<i64: 1>}, {transform_indices = @transform_1, window_bounds = array<i64: 8, 1024>}, {transform_indices = @transform_2, window_bounds = array<i64: 8, 1024>}, {transform_indices = @transform_3, window_bounds = array<i64: 8, 1024>}]} {
    %c0 = arith.constant 0 : index
    %0 = memref.load %arg1[%c0] : memref<1xf32, #tpu.memory_space<smem>>
    %c0_0 = arith.constant 0 : index
    %c0_1 = arith.constant 0 : index
    %1 = vector.load %arg2[%c0_0, %c0_1] : memref<8x1024xf32, #tpu.memory_space<vmem>>, vector<8x1024xf32>
    %c0_2 = arith.constant 0 : index
    %c0_3 = arith.constant 0 : index
    %2 = vector.load %arg3[%c0_2, %c0_3] : memref<8x1024xf32, #tpu.memory_space<vmem>>, vector<8x1024xf32>
    %3 = arith.subf %2, %1 : vector<8x1024xf32>
    %4 = vector.broadcast %0 : f32 to vector<8x1024xf32>
    %5 = arith.mulf %4, %3 : vector<8x1024xf32>
    %6 = arith.addf %1, %5 : vector<8x1024xf32>
    %c0_4 = arith.constant 0 : index
    %c0_5 = arith.constant 0 : index
    %7 = vector.load %arg4[%c0_4, %c0_5] : memref<8x1024xf32, #tpu.memory_space<vmem>>, vector<8x1024xf32>
    tpu.vector_store %arg4[%c0_4, %c0_5], %6 {strides = array<i32>} : memref<8x1024xf32, #tpu.memory_space<vmem>>, vector<8x1024xf32>,
    return
  }
  func.func @transform_0(%arg0: i32) -> i32 {
    %c0_i32 = arith.constant 0 : i32
    %c0_i32_0 = arith.constant 0 : i32
    return %c0_i32 : i32
  }
  func.func @transform_1(%arg0: i32) -> (i32, i32) {
    %c0_i32 = arith.constant 0 : i32
    %c0_i32_0 = arith.constant 0 : i32
    return %arg0, %c0_i32 : i32, i32
  }
  func.func @transform_2(%arg0: i32) -> (i32, i32) {
    %c0_i32 = arith.constant 0 : i32
    %c0_i32_0 = arith.constant 0 : i32
    return %arg0, %c0_i32 : i32, i32
  }
  func.func @transform_3(%arg0: i32) -> (i32, i32) {
    %c0_i32 = arith.constant 0 : i32
    %c0_i32_0 = arith.constant 0 : i32
    return %arg0, %c0_i32 : i32, i32
  }
}

</mosaic_0001>

<bundles_post_ra>
// kernel: tpu_custom_call.1
= control target key start
LH: loop header
LB: loop body
LE: loop exit
PB: predicated region body
PF: predicated region fallthrough
CT: control target
= control target key end

     0   :  { %9 = vsyncpa [#allocation4], 0  ;;  %s243_s0 = inlined_call_operand.<no memory space> [shape: f32[1], index: 0, kind: input, shape index: {}]   ;;  %s244_s1 = inlined_call_operand.hbm [shape: f32[8,1024], index: 1, kind: input, shape index: {}]   ;;  %s245_s2 = inlined_call_operand.hbm [shape: f32[8,1024], index: 2, kind: input, shape index: {}]   ;;  %s246_s3 = inlined_call_operand.hbm [shape: f32[8,1024], index: 3, kind: output, shape index: {}]  }
   0x1   :  { %10 = vsyncpa [#allocation7], 0 }
   0x2   :  { %11 = vsyncpa [#allocation5], 0  ;;  %s181_s12 = smov [#allocation3]   ;;  %s182_s14 = smov [#allocation6]  }
   0x3   :  { %s20_s13 = sshll.u32 %s181_s12, 4  ;;  %s30_s15 = sshll.u32 %s182_s14, 4  ;;  %s21_s13 = int_to_ptr.vmem [resolvable:$true] %s20_s13  ;;  %s31_s15 = int_to_ptr.vmem [resolvable:$true] %s30_s15 }
   0x4   :  { %s109_s18 = scalar_lea.hbm %s244_s1, 1024 }
   0x5   :  { %p110_p0 = scmp.ne.s32.totalorder %s244_s1, %s109_s18  ;;  %p113_p1 = scmp.lt.u32.totalorder %s109_s18, %s244_s1 }
   0x7   :  { %p115_p2 = pnand %p113_p1, %p110_p0 }
   0x9   :  { %118 = shalt.err (!%p115_p2)
}
   0xa   :  { %s119_s23 = scalar_lea.vmem %s21_s13, 1024  ;;  %p124_p4 = scmp.lt.s32.totalorder %s21_s13, %s21_s13 }
   0xb   :  { %p120_p3 = scmp.ne.s32.totalorder %s21_s13, %s119_s23  ;;  %p125_p5 = scmp.lt.s32.totalorder %s119_s23, %s119_s23 }
   0xd   :  { %p126_p6 = por %p125_p5, %p124_p4 }
   0xf   :  { %p127_p7 = pnand %p126_p6, %p120_p3 }
  0x11   :  { %130 = shalt.err (!%p127_p7)
}
  0x12   :  { %23 = dma.hbm_to_vmem [thread:$0]  %s244_s1, 1024, %s21_s13, [#allocation4]  }
  0x13   :  { %s131_s28 = scalar_lea.hbm %s245_s2, 1024 }
  0x14   :  { %p132_p8 = scmp.ne.s32.totalorder %s245_s2, %s131_s28  ;;  %p135_p9 = scmp.lt.u32.totalorder %s131_s28, %s245_s2 }
  0x16   :  { %p137_p10 = pnand %p135_p9, %p132_p8 }
  0x18   :  { %140 = shalt.err (!%p137_p10)
}
  0x19   :  { %s141_s6 = scalar_lea.vmem %s31_s15, 1024  ;;  %p146_p12 = scmp.lt.s32.totalorder %s31_s15, %s31_s15 }
  0x1a   :  { %p142_p11 = scmp.ne.s32.totalorder %s31_s15, %s141_s6  ;;  %p147_p13 = scmp.lt.s32.totalorder %s141_s6, %s141_s6 }
  0x1c   :  { %p148_p0 = por %p147_p13, %p146_p12 }
  0x1e   :  { %p149_p1 = pnand %p148_p0, %p142_p11 }
  0x20   :  { %152 = shalt.err (!%p149_p1)
}
  0x21   :  { %33 = dma.hbm_to_vmem [thread:$0]  %s245_s2, 1024, %s31_s15, [#allocation7]  }
  0x22   :  { %175 = dma.done.wait [#allocation4], 1024  }
  0x23   :  { %176 = vsyncadd [#allocation4], 4294966272 }
  0x24   :  { %177 = dma.done.wait [#allocation7], 1024  }
  0x25   :  { %178 = vsyncadd [#allocation7], 4294966272  ;;  %v41_v0 = vld [vmem:[#allocation3] sm:$0xff]  ;;  %v65_v2 = vstv %s243_s0  ;;  %v42_v3 = vld [vmem:[#allocation3 + $0x8] sm:$0xff]  ;;  %s183_s0 = smov [#allocation8]  }
  0x26   :  { %v49_v1 = vld [vmem:[#allocation6] sm:$0xff]  ;;  %v50_v5 = vld [vmem:[#allocation6 + $0x8] sm:$0xff]  ;;  %v43_v6 = vld [vmem:[#allocation3 + $0x10] sm:$0xff]  ;;  %s96_s2 = sshll.u32 %s183_s0, 4  ;;  %s97_s2 = int_to_ptr.vmem [resolvable:$true] %s96_s2 }
  0x27   :  { %v57_v4 = vsub.f32 %v49_v1, %v41_v0  ;;  %v51_v7 = vld [vmem:[#allocation6 + $0x10] sm:$0xff]  ;;  %v58_v8 = vsub.f32 %v50_v5, %v42_v3  ;;  %v44_v10 = vld [vmem:[#allocation3 + $0x18] sm:$0xff]  ;;  %v45_v12 = vld [vmem:[#allocation3 + $0x20] sm:$0xff]  ;;  %s153_s10 = scalar_lea.vmem %s97_s2, 1024  ;;  %p158_p3 = scmp.lt.s32.totalorder %s97_s2, %s97_s2 }
  0x28   :  { %v59_v9 = vsub.f32 %v51_v7, %v43_v6  ;;  %v52_v11 = vld [vmem:[#allocation6 + $0x18] sm:$0xff]  ;;  %v53_v15 = vld [vmem:[#allocation6 + $0x20] sm:$0xff]  ;;  %v46_v16 = vld [vmem:[#allocation3 + $0x28] sm:$0xff]  ;;  %p154_p2 = scmp.ne.s32.totalorder %s97_s2, %s153_s10  ;;  %p159_p4 = scmp.lt.s32.totalorder %s153_s10, %s153_s10 }
  0x29   :  { %v66_v13 = vmul.f32 %v65_v2, %v57_v4  ;;  %v60_v14 = vsub.f32 %v52_v11, %v44_v10  ;;  %v54_v17 = vld [vmem:[#allocation6 + $0x28] sm:$0xff]  ;;  %v67_v18 = vmul.f32 %v65_v2, %v58_v8  ;;  %v61_v20 = vsub.f32 %v53_v15, %v45_v12  ;;  %v47_v22 = vld [vmem:[#allocation3 + $0x30] sm:$0xff]  ;;  %v48_v24 = vld [vmem:[#allocation3 + $0x38] sm:$0xff] }
  0x2a   :  { %v68_v19 = vmul.f32 %v65_v2, %v59_v9  ;;  %v62_v21 = vsub.f32 %v54_v17, %v46_v16  ;;  %v55_v23 = vld [vmem:[#allocation6 + $0x30] sm:$0xff]  ;;  %v56_v28 = vld [vmem:[#allocation6 + $0x38] sm:$0xff]  ;;  %p160_p5 = por %p159_p4, %p158_p3 }
  0x2b   :  { %v74_v25 = vadd.f32 %v66_v13, %v41_v0  ;;  %v69_v26 = vmul.f32 %v65_v2, %v60_v14  ;;  %v63_v27 = vsub.f32 %v55_v23, %v47_v22  ;;  %v75_v29 = vadd.f32 %v67_v18, %v42_v3 }
  0x2c   :  { %v76_v30 = vadd.f32 %v68_v19, %v43_v6  ;;  %v70_v31 = vmul.f32 %v65_v2, %v61_v20  ;;  %v71_v32 = vmul.f32 %v65_v2, %v62_v21  ;;  %v64_v35 = vsub.f32 %v56_v28, %v48_v24  ;;  %p161_p6 = pnand %p160_p5, %p154_p2 }
  0x2d   :  { %82 = vst [vmem:[#allocation8] sm:$0xff] %v74_v25  ;;  %v77_v33 = vadd.f32 %v69_v26, %v44_v10  ;;  %v72_v34 = vmul.f32 %v65_v2, %v63_v27  ;;  %83 = vst [vmem:[#allocation8 + $0x8] sm:$0xff] %v75_v29 }
  0x2e   :  { %84 = vst [vmem:[#allocation8 + $0x10] sm:$0xff] %v76_v30  ;;  %v78_v36 = vadd.f32 %v70_v31, %v45_v12  ;;  %v79_v37 = vadd.f32 %v71_v32, %v46_v16  ;;  %v73_v39 = vmul.f32 %v65_v2, %v64_v35 }
  0x2f   :  { %85 = vst [vmem:[#allocation8 + $0x18] sm:$0xff] %v77_v33  ;;  %v80_v38 = vadd.f32 %v72_v34, %v47_v22 }
  0x30   :  { %86 = vst [vmem:[#allocation8 + $0x20] sm:$0xff] %v78_v36  ;;  %87 = vst [vmem:[#allocation8 + $0x28] sm:$0xff] %v79_v37  ;;  %v81_v40 = vadd.f32 %v73_v39, %v48_v24 }
  0x31   :  { %88 = vst [vmem:[#allocation8 + $0x30] sm:$0xff] %v80_v38 }
  0x32   :  { %89 = vst [vmem:[#allocation8 + $0x38] sm:$0xff] %v81_v40 }
  0x33   :  { %164 = shalt.err (!%p161_p6)
}
  0x34   :  { %s165_s13 = scalar_lea.hbm %s246_s3, 1024 }
  0x35   :  { %p166_p7 = scmp.ne.s32.totalorder %s246_s3, %s165_s13  ;;  %p169_p8 = scmp.lt.u32.totalorder %s165_s13, %s246_s3 }
  0x37   :  { %p171_p9 = pnand %p169_p8, %p166_p7 }
  0x39   :  { %174 = shalt.err (!%p171_p9)
}
  0x3a   :  { %99 = dma.vmem_to_hbm [thread:$0]  %s97_s2, 1024, %s246_s3, [#allocation5]  }
  0x3b   :  { %179 = dma.done.wait [#allocation5], 1024  }
  0x3c   :  { %180 = vsyncadd [#allocation5], 4294966272 }
  0x3d   :  { %103 = vsyncpa [#allocation4], 1 }
  0x3e   :  { %104 = vsyncpa [#allocation7], 1 }
  0x3f   :  { %105 = vsyncpa [#allocation5], 1 }

</bundles_post_ra>
